<compile_context>
chip_gen: v6e
topology: v6e:2x2x1
jax: 0.10.0
libtpu: 0.0.40
codegen_flags: <defaults>
</compile_context>

<pallas_src>
import math

import jax
import jax.numpy as jnp
from jax.experimental import pallas as pl
from jax.experimental.pallas import tpu as pltpu


def _round_up(x, m):
    return (x + m - 1) // m * m


# ---------------------------------------------------------------------------
# Pallas kernel: fused linear over all degrees
#   x_ref: (TB, F_in_pad)        batch tile x all (l, i, m) input features
#   w_ref: (F_in_pad, F_out_pad) block-diagonal kron(W_l, I_{2l+1}) weights
#   b_ref: (1, F_out_pad)        bias row (nonzero only on l=0 output columns)
#   o_ref: (TB, F_out_pad)       lane-dense (multiple of 128) output tile
# ---------------------------------------------------------------------------
def _so3_fused_kernel(x_ref, w_ref, b_ref, o_ref):
    acc = jnp.dot(x_ref[...], w_ref[...], preferred_element_type=jnp.float32)
    o_ref[...] = (acc + b_ref[...]).astype(o_ref.dtype)


# ---------------------------------------------------------------------------
# Module factory: static metadata closed over; params packed once; jitted forward
# ---------------------------------------------------------------------------
def make_so3_linearity(ls, in_muls, out_muls, use_bias, dtype=jnp.float32):
    ls = tuple(sorted(ls))
    dims_in = {l: in_muls[l] * (2 * l + 1) for l in ls}
    dims_out = {l: out_muls[l] * (2 * l + 1) for l in ls}
    F_in = sum(dims_in.values())
    F_out = sum(dims_out.values())
    F_in_pad = _round_up(F_in, 128)
    F_out_pad = _round_up(F_out, 128)

    in_offs, out_offs = {}, {}
    oi = oo = 0
    for l in ls:
        in_offs[l] = oi
        out_offs[l] = oo
        oi += dims_in[l]
        oo += dims_out[l]

    def prepare_params(weights, bias_params=None):
        """One-time packing: block-diagonal kron weight + dense bias row."""
        w_big = jnp.zeros((F_in_pad, F_out_pad), dtype=dtype)
        for l in ls:
            m = 2 * l + 1
            blk = jnp.kron(weights[l].astype(dtype), jnp.eye(m, dtype=dtype))
            w_big = w_big.at[in_offs[l]:in_offs[l] + dims_in[l],
                             out_offs[l]:out_offs[l] + dims_out[l]].set(blk)
        bias_row = jnp.zeros((1, F_out_pad), dtype=dtype)
        if use_bias and (0 in ls) and (bias_params is not None):
            bias_row = bias_row.at[0, out_offs[0]:out_offs[0] + out_muls[0]].set(
                bias_params.reshape(-1).astype(dtype))
        return w_big, bias_row

    @jax.jit
    def forward(x, w_big, bias_row):
        B = x[ls[0]].shape[0]
        # Batch tiling: small B -> single (8,128)-aligned tile; large B -> 256-row
        # tiles on a "parallel" grid axis (double-buffered DMA, megacore on v7x,
        # VMEM stays well under the 16/32 MiB scoped defaults).
        if B <= 256:
            TB = _round_up(max(B, 1), 8)
            B_pad = TB
        else:
            TB = 256
            B_pad = _round_up(B, TB)

        # Flatten each degree (contiguous reshape, no transpose) and concat once.
        parts = [x[l].reshape(B, dims_in[l]).astype(dtype) for l in ls]
        X = jnp.concatenate(parts, axis=1)                      # (B, F_in)
        X = jnp.pad(X, ((0, B_pad - B), (0, F_in_pad - F_in)))  # (B_pad, F_in_pad)

        Y = pl.pallas_call(
            _so3_fused_kernel,
            out_shape=jax.ShapeDtypeStruct((B_pad, F_out_pad), dtype),
            grid=(B_pad // TB,),
            in_specs=[
                pl.BlockSpec((TB, F_in_pad), lambda i: (i, 0)),
                pl.BlockSpec((F_in_pad, F_out_pad), lambda i: (0, 0)),
                pl.BlockSpec((1, F_out_pad), lambda i: (0, 0)),
            ],
            out_specs=pl.BlockSpec((TB, F_out_pad), lambda i: (i, 0)),
            compiler_params=pltpu.CompilerParams(
                dimension_semantics=("parallel",)),
        )(X, w_big, bias_row)

        # Split the lane-dense slab back into the per-degree dict (glue only).
        out = {}
        for l in ls:
            out[l] = Y[:B, out_offs[l]:out_offs[l] + dims_out[l]].reshape(
                B, out_muls[l], 2 * l + 1)
        return out

    return prepare_params, forward


# ---------------------------------------------------------------------------
# Deterministic parameter init (Xavier uniform, like torch.nn.init.xavier_uniform_)
# ---------------------------------------------------------------------------
def xavier_uniform(key, shape, gain=1.0, dtype=jnp.float32):
    fan_in, fan_out = shape
    limit = gain * math.sqrt(6.0 / (fan_in + fan_out))
    return jax.random.uniform(key, shape, dtype=dtype, minval=-limit, maxval=limit)


if __name__ == "__main__":
    # irreps_in  ~ "4x0e + 8x1o + 4x2e",  irreps_out ~ "6x0e + 4x1o + 2x2e"
    ls = [0, 1, 2]
    in_muls = {0: 4, 1: 8, 2: 4}
    out_muls = {0: 6, 1: 4, 2: 2}
    batch = 2
    use_bias = True

    key = jax.random.PRNGKey(0)
    k_w, k_x = jax.random.split(key)

    # parameters (per-l weights, same as the torch module's ParameterDict)
    weights = {}
    wkeys = jax.random.split(k_w, len(ls))
    for l, kl in zip(ls, wkeys):
        weights[l] = xavier_uniform(kl, (in_muls[l], out_muls[l]), gain=1.0)
    bias_params = (jnp.zeros((out_muls[0], 1), dtype=jnp.float32) + 0.1
                   if use_bias else None)

    # inputs: x[l] has shape (batch, in_mul_l, 2l+1)
    x = {}
    xkeys = jax.random.split(k_x, len(ls))
    for l, kl in zip(ls, xkeys):
        x[l] = jax.random.normal(kl, (batch, in_muls[l], 2 * l + 1), dtype=jnp.float32)

    # build the fused module: pack params once, run the single-launch forward
    prepare_params, forward = make_so3_linearity(ls, in_muls, out_muls, use_bias)
    w_big, bias_row = prepare_params(weights, bias_params)
    w_big, bias_row = jax.block_until_ready(w_big), jax.block_until_ready(bias_row)

    out = forward(x, w_big, bias_row)
    out = jax.tree_util.tree_map(jax.block_until_ready, out)

    # reference check against plain-JAX einsum (same semantics as the torch module)
    ok = True
    for l in ls:
        ref = jnp.einsum('ij,bim->bjm', weights[l], x[l])
        if l == 0 and use_bias:
            ref = ref + bias_params
        ok &= out[l].shape == (batch, out_muls[l], 2 * l + 1)
        ok &= bool(jnp.allclose(out[l], ref, atol=1e-5, rtol=1e-5))

    if ok:
        print("KERNEL_OK")
    else:
        print("KERNEL_MISMATCH")
</pallas_src>

<mosaic_0001>
module attributes {stable_mosaic.version = 11 : i64} {
  func.func @_so3_fused_kernel(%arg0: i32, %arg1: memref<8x128xf32, #tpu.memory_space<vmem>>, %arg2: memref<128x128xf32, #tpu.memory_space<vmem>>, %arg3: memref<1x128xf32, #tpu.memory_space<vmem>>, %arg4: memref<8x128xf32, #tpu.memory_space<vmem>>) attributes {dimension_semantics = [#tpu.dimension_semantics<parallel>], iteration_bounds = array<i64: 1>, scalar_prefetch = 0 : i64, scratch_operands = 0 : i64, tpu.core_type = #tpu.core_type<tc>, window_params = [{transform_indices = @transform_0, window_bounds = array<i64: 8, 128>}, {pipeline_mode = #tpu.pipeline_mode<synchronous>, transform_indices = @transform_1, window_bounds = array<i64: 128, 128>}, {pipeline_mode = #tpu.pipeline_mode<synchronous>, transform_indices = @transform_2, window_bounds = array<i64: 1, 128>}, {transform_indices = @transform_3, window_bounds = array<i64: 8, 128>}]} {
    %c0 = arith.constant 0 : index
    %c0_0 = arith.constant 0 : index
    %0 = vector.load %arg1[%c0, %c0_0] : memref<8x128xf32, #tpu.memory_space<vmem>>, vector<8x128xf32>
    %c0_1 = arith.constant 0 : index
    %c0_2 = arith.constant 0 : index
    %1 = vector.load %arg2[%c0_1, %c0_2] : memref<128x128xf32, #tpu.memory_space<vmem>>, vector<128x128xf32>
    %cst = arith.constant dense<0.000000e+00> : vector<8x128xf32>
    %2 = tpu.matmul %0, %1, %cst {dimension_numbers = #tpu.dot_dimension_numbers<[1], [0], [0], [1], [0, 0, 1, 1], [], []>} : vector<8x128xf32>, vector<128x128xf32>, vector<8x128xf32> -> vector<8x128xf32>
    %c0_3 = arith.constant 0 : index
    %c0_4 = arith.constant 0 : index
    %3 = vector.load %arg3[%c0_3, %c0_4] : memref<1x128xf32, #tpu.memory_space<vmem>>, vector<1x128xf32>
    %4 = vector.broadcast %3 : vector<1x128xf32> to vector<8x128xf32>
    %5 = arith.addf %2, %4 : vector<8x128xf32>
    %c0_5 = arith.constant 0 : index
    %c0_6 = arith.constant 0 : index
    %6 = vector.load %arg4[%c0_5, %c0_6] : memref<8x128xf32, #tpu.memory_space<vmem>>, vector<8x128xf32>
    tpu.vector_store %arg4[%c0_5, %c0_6], %5 {strides = array<i32>} : memref<8x128xf32, #tpu.memory_space<vmem>>, vector<8x128xf32>,
    return
  }
  func.func @transform_0(%arg0: i32) -> (i32, i32) {
    %c0_i32 = arith.constant 0 : i32
    %c0_i32_0 = arith.constant 0 : i32
    return %arg0, %c0_i32 : i32, i32
  }
  func.func @transform_1(%arg0: i32) -> (i32, i32) {
    %c0_i32 = arith.constant 0 : i32
    %c0_i32_0 = arith.constant 0 : i32
    %c0_i32_1 = arith.constant 0 : i32
    return %c0_i32, %c0_i32_0 : i32, i32
  }
  func.func @transform_2(%arg0: i32) -> (i32, i32) {
    %c0_i32 = arith.constant 0 : i32
    %c0_i32_0 = arith.constant 0 : i32
    %c0_i32_1 = arith.constant 0 : i32
    return %c0_i32, %c0_i32_0 : i32, i32
  }
  func.func @transform_3(%arg0: i32) -> (i32, i32) {
    %c0_i32 = arith.constant 0 : i32
    %c0_i32_0 = arith.constant 0 : i32
    return %arg0, %c0_i32 : i32, i32
  }
}

</mosaic_0001>

<bundles_post_ra>
// kernel: forward.1
= control target key start
LH: loop header
LB: loop body
LE: loop exit
PB: predicated region body
PF: predicated region fallthrough
CT: control target
= control target key end

     0   :  { %8 = vsyncpa [#allocation3], 0  ;;  %s208_s12 = smov [#allocation2]   ;;  %s245_s0 = inlined_call_operand.vmem [shape: f32[8,128], index: 0, kind: input, shape index: {}]   ;;  %s246_s1 = inlined_call_operand.hbm [shape: f32[128,128], index: 1, kind: input, shape index: {}]   ;;  %s247_s2 = inlined_call_operand.vmem [shape: f32[1,128], index: 2, kind: input, shape index: {}]   ;;  %s248_s3 = inlined_call_operand.vmem [shape: f32[8,128], index: 3, kind: output, shape index: {}]  }
   0x1   :  { %s16_s13 = sshll.u32 %s208_s12, 4  ;;  %s17_s13 = int_to_ptr.vmem [resolvable:$true] %s16_s13 }
   0x2   :  { %s194_s14 = scalar_lea.vmem %s17_s13, 2048  ;;  %p199_p1 = scmp.lt.s32.totalorder %s17_s13, %s17_s13 }
   0x3   :  { %p195_p0 = scmp.ne.s32.totalorder %s17_s13, %s194_s14  ;;  %p200_p2 = scmp.lt.s32.totalorder %s194_s14, %s194_s14 }
   0x5   :  { %p201_p3 = por %p200_p2, %p199_p1 }
   0x7   :  { %p202_p4 = pnand %p201_p3, %p195_p0 }
   0x9   :  { %205 = shalt.err (!%p202_p4)
}
   0xa   :  { %s209_s15 = smov 128   ;;  %s210_s16 = smov 8  }
   0xb   :  { %22 = dma.hbm_to_vmem [thread:$0]  %s246_s1, 2048, %s17_s13, [#allocation3], %s209_s15, %s209_s15, %s210_s16  }
   0xc   :  { %206 = dma.done.wait [#allocation3], 2048  }
   0xd   :  { %207 = vsyncadd [#allocation3], 4294965248  ;;  %v211_v0 = vmov 0.0   ;;  %vm212_vm0 = vmmov 0   ;;  %v44_v1 = vld [vmem:[#allocation2 + $0x78] sm:$0xff]  ;;  %v43_v2 = vld [vmem:[#allocation2 + $0x70] sm:$0xff] }
   0xe   :  { %146 = vmatprep.subr.mxu0 %v211_v0  ;;  %178 = vmatprep.mubr.msk.f32.mxu0 %vm212_vm0, %v211_v0  ;;  %v42_v3 = vld [vmem:[#allocation2 + $0x68] sm:$0xff]  ;;  %v41_v4 = vld [vmem:[#allocation2 + $0x60] sm:$0xff]  ;;  %v40_v5 = vld [vmem:[#allocation2 + $0x58] sm:$0xff] }
   0xf   :  { %147 = vmatpush3.msra.mxu0 %v44_v1  ;;  %v39_v6 = vld [vmem:[#allocation2 + $0x50] sm:$0xff]  ;;  %v38_v7 = vld [vmem:[#allocation2 + $0x48] sm:$0xff]  ;;  %v37_v8 = vld [vmem:[#allocation2 + $0x40] sm:$0xff] }
  0x10   :  { %148 = vmatprep.subr.mxu0 %v211_v0  ;;  %v36_v9 = vld [vmem:[#allocation2 + $0x38] sm:$0xff]  ;;  %v35_v10 = vld [vmem:[#allocation2 + $0x30] sm:$0xff]  ;;  %v34_v11 = vld [vmem:[#allocation2 + $0x28] sm:$0xff] }
  0x11   :  { %149 = vmatpush3.msra.mxu0 %v43_v2  ;;  %v33_v12 = vld [vmem:[#allocation2 + $0x20] sm:$0xff]  ;;  %v32_v13 = vld [vmem:[#allocation2 + $0x18] sm:$0xff]  ;;  %v31_v14 = vld [vmem:[#allocation2 + $0x10] sm:$0xff] }
  0x12   :  { %150 = vmatprep.subr.mxu0 %v211_v0  ;;  %v30_v15 = vld [vmem:[#allocation2 + $0x8] sm:$0xff]  ;;  %v29_v16 = vld [vmem:[#allocation2] sm:$0xff] }
  0x13   :  { %151 = vmatpush3.msra.mxu0 %v42_v3  ;;  %v28_v17 = vld [vmem:[%s245_s0] sm:$0xff] }
  0x14   :  { %152 = vmatprep.subr.mxu0 %v211_v0  ;;  %v128_v18 = vld [vmem:[%s247_s2] ss:$0 sm:$0xff] }
  0x15   :  { %153 = vmatpush3.msra.mxu0 %v41_v4 }
  0x16   :  { %154 = vmatprep.subr.mxu0 %v211_v0 }
  0x17   :  { %155 = vmatpush3.msra.mxu0 %v40_v5 }
  0x18   :  { %156 = vmatprep.subr.mxu0 %v211_v0 }
  0x19   :  { %157 = vmatpush3.msra.mxu0 %v39_v6 }
  0x1a   :  { %158 = vmatprep.subr.mxu0 %v211_v0 }
  0x1b   :  { %159 = vmatpush3.msra.mxu0 %v38_v7 }
  0x1c   :  { %160 = vmatprep.subr.mxu0 %v211_v0 }
  0x1d   :  { %161 = vmatpush3.msra.mxu0 %v37_v8 }
  0x1e   :  { %162 = vmatprep.subr.mxu0 %v211_v0 }
  0x1f   :  { %163 = vmatpush3.msra.mxu0 %v36_v9 }
  0x20   :  { %164 = vmatprep.subr.mxu0 %v211_v0 }
  0x21   :  { %165 = vmatpush3.msra.mxu0 %v35_v10 }
  0x22   :  { %166 = vmatprep.subr.mxu0 %v211_v0 }
  0x23   :  { %167 = vmatpush3.msra.mxu0 %v34_v11 }
  0x24   :  { %168 = vmatprep.subr.mxu0 %v211_v0 }
  0x25   :  { %169 = vmatpush3.msra.mxu0 %v33_v12 }
  0x26   :  { %170 = vmatprep.subr.mxu0 %v211_v0 }
  0x27   :  { %171 = vmatpush3.msra.mxu0 %v32_v13 }
  0x28   :  { %172 = vmatprep.subr.mxu0 %v211_v0 }
  0x29   :  { %173 = vmatpush3.msra.mxu0 %v31_v14 }
  0x2a   :  { %174 = vmatprep.subr.mxu0 %v211_v0 }
  0x2b   :  { %175 = vmatpush3.msra.mxu0 %v30_v15 }
  0x2c   :  { %176 = vmatprep.subr.mxu0 %v211_v0 }
  0x2d   :  { %177 = vmatpush3.msra.mxu0 %v29_v16 }
  0x2e   :  { %179 = vmatmul.mubr.f32.vlgmr.msra.gmra.mxu0 %v28_v17 }
  0xee   :  { %v118_v19 = vpop.f32.mrf.mxu0 }
  0xef   :  { %v119_v20 = vadd.f32 %v128_v18, %v118_v19 }
  0xf0   :  { %v180_v21 = vpop.f32.mrf.mxu0 }
  0xf1   :  { %122 = vst [vmem:[%s248_s3] sm:$0xff] %v119_v20 }
  0xf2   :  { %127 = vsyncpa [#allocation3], 1 }

</bundles_post_ra>
